<compile_context>
chip_gen: v5e
topology: v5e:2x2
jax: 0.10.0
libtpu: 0.0.40
codegen_flags: <defaults>
</compile_context>

<pallas_src>
import math

import numpy as np

import jax
import jax.numpy as jnp
from jax.experimental import pallas as pl
from jax.experimental.pallas import tpu as pltpu


def _dice_kernel(x_ref, u_ref, lo_ref, inv_ref, fmask_ref, cfmask_ref,
                 last_ref, bsel_ref, w_ref, o_ref):
    f32 = jnp.float32
    hp = jax.lax.Precision.HIGHEST

    x = x_ref[0]            # (TB, GP)
    u = u_ref[0]            # (TB, GP)  uniform(-pi, pi) fallback noise
    lo = lo_ref[0]          # (1, GP)
    inv = inv_ref[0]        # (1, GP)   1 / (hi - lo), precomputed (no divide)

    # Normalize into [0, 1]; out-of-range values use the supplied noise.
    # (hi == lo gives inf/NaN here exactly like the torch division; the
    #  where() then selects the noise branch because NaN compares are false.)
    t = (x - lo) * inv
    in_range = (t >= 0.0) & (t <= 1.0)
    t = jnp.where(in_range, t * jnp.pi, u)

    # Only two transcendental evaluations per (row, feature).  A (TB, GP)
    # block occupies the same vregs as (TB, 128), so trig cost per step is
    # already minimal for the GD = 128 grouping.
    s = jnp.sin(t)          # (TB, GP)
    c = jnp.cos(t)          # (TB, GP)

    # Lane-dense broadcast on the MXU (exact 0/1 selection matrices) instead
    # of a serial VPU add chain:  s_big[:, g*d + k] = s[:, g].
    s_big = jnp.dot(s, fmask_ref[...], preferred_element_type=f32, precision=hp)
    # Coefficient with the "last column = 1" fold baked into the matrices:
    # coeff[:, g*d + k] = cos(t_g) for k < d-1, and 1 for k == d-1.
    coeff = (jnp.dot(c, cfmask_ref[...], preferred_element_type=f32, precision=hp)
             + last_ref[...])

    # p[:, g*d + k] = s[:, g] ** k via binary exponentiation with select
    # blends (1 mul + 1 vsel per bit; exact integer powers, no exp/log).
    bsel = bsel_ref[...]                      # (NBITS, GD) 0/1: bit j of k
    nbits = bsel.shape[0]
    p = jnp.where(bsel[0:1, :] > 0.5, s_big, jnp.ones_like(s_big))
    sq = s_big
    for j in range(1, nbits):
        sq = sq * sq
        p = jnp.where(bsel[j:j + 1, :] > 0.5, p * sq, p)

    feats = p * coeff

    # One lane-dense (TB, GD) @ (GD, GD) MXU matmul against block-diagonal Q.
    o_ref[...] = jnp.dot(feats, w_ref[0], preferred_element_type=f32, precision=hp)


def make_dice_embeddings(Qs, lower_bounds, upper_bounds, *, max_batch_tile=1024):
    """Precompute all static operands once; return jitted forward(x, noise)."""
    Qs_np = np.asarray(Qs, np.float32)
    lo_np = np.asarray(lower_bounds, np.float32)
    hi_np = np.asarray(upper_bounds, np.float32)
    F, d, _ = Qs_np.shape
    f32 = jnp.float32

    # ---- feature grouping: GD = G*d multiple of 128 -> unmasked lane-dense
    # output stores and a bounded (GD, GD) block-diagonal Q.  GD = 128 is the
    # v5e-safe choice (GD = 256 is a further option on v6e/v7x).
    G = math.lcm(128, d) // d
    if G * d > 512:
        # awkward d: fall back to one group spanning all features
        # (output block then equals the full last dim -> still legal).
        G = F
    NG = -(-F // G)
    F_pad = NG * G
    GD = G * d
    GP = ((G + 7) // 8) * 8          # pad narrow per-group width to a sublane multiple

    # ---- static host-side tables (built once, closed over below) -----------
    lo_grp = np.zeros((NG, GP), np.float32)
    hi_grp = np.ones((NG, GP), np.float32)
    for n in range(NG):
        for g in range(G):
            f = n * G + g
            if f < F:
                lo_grp[n, g] = lo_np[f]
                hi_grp[n, g] = hi_np[f]
    # NOTE: hi == lo yields inf here, exactly like the torch module's division.
    with np.errstate(divide="ignore"):
        inv_grp = 1.0 / (hi_grp - lo_grp)

    q_p = np.zeros((F_pad, d, d), np.float32)
    q_p[:F] = Qs_np
    q_grp = q_p.reshape(NG, G, d, d)
    W = np.zeros((NG, GD, GD), np.float32)
    for g in range(G):
        W[:, g * d:(g + 1) * d, g * d:(g + 1) * d] = q_grp[:, g]

    k_col = np.tile(np.arange(d, dtype=np.int64), G)                  # (GD,)
    nbits = max(1, int(d - 1).bit_length())
    bsel = np.stack(
        [((k_col >> j) & 1).astype(np.float32) for j in range(nbits)])  # (NBITS, GD)
    fmask = np.zeros((GP, GD), np.float32)
    for g in range(G):
        fmask[g, g * d:(g + 1) * d] = 1.0
    cfmask = fmask * (k_col < (d - 1)).astype(np.float32)[None, :]    # cos columns only
    last = (k_col == (d - 1)).astype(np.float32)[None, :]             # +1 on sin^(d-1)

    lo_d = jnp.asarray(lo_grp.reshape(NG, 1, GP))
    inv_d = jnp.asarray(inv_grp.reshape(NG, 1, GP))
    W_d = jnp.asarray(W)
    fmask_d = jnp.asarray(fmask)
    cfmask_d = jnp.asarray(cfmask)
    last_d = jnp.asarray(last)
    bsel_d = jnp.asarray(bsel)

    @jax.jit
    def forward(x, noise):
        B = x.shape[0]
        assert x.shape == (B, F) and noise.shape == (B, F)

        # batch tile: multiple of 8 sublanes, large to amortize the ~0.35us
        # per-step pipeline overhead; per-step VMEM stays ~1-2 MiB, well under
        # the 32 MiB scoped limit (v7x-safe: total physical VMEM is 64 MiB).
        TB = min(max_batch_tile, ((B + 7) // 8) * 8)
        NBT = -(-B // TB)
        B_pad = NBT * TB

        def group(a):
            ap = jnp.pad(a.astype(f32), ((0, B_pad - B), (0, F_pad - F)))
            ag = ap.reshape(B_pad, NG, G).transpose(1, 0, 2)        # (NG, B_pad, G)
            if GP != G:
                ag = jnp.pad(ag, ((0, 0), (0, 0), (0, GP - G)))
            return ag

        x_g = group(x)
        u_g = group(noise)

        out_p = pl.pallas_call(
            _dice_kernel,
            out_shape=jax.ShapeDtypeStruct((B_pad, F_pad * d), f32),
            grid=(NBT, NG),   # batch tiles outermost -> non-degenerate core split
            in_specs=[
                pl.BlockSpec((1, TB, GP), lambda bi, gi: (gi, bi, 0)),    # x
                pl.BlockSpec((1, TB, GP), lambda bi, gi: (gi, bi, 0)),    # noise
                pl.BlockSpec((1, 1, GP), lambda bi, gi: (gi, 0, 0)),      # lower bound
                pl.BlockSpec((1, 1, GP), lambda bi, gi: (gi, 0, 0)),      # 1/(hi-lo)
                pl.BlockSpec((GP, GD), lambda bi, gi: (0, 0)),            # feature mask
                pl.BlockSpec((GP, GD), lambda bi, gi: (0, 0)),            # cos mask
                pl.BlockSpec((1, GD), lambda bi, gi: (0, 0)),             # +1 last col
                pl.BlockSpec((nbits, GD), lambda bi, gi: (0, 0)),         # exponent bits
                pl.BlockSpec((1, GD, GD), lambda bi, gi: (gi, 0, 0)),     # block-diag Q
            ],
            out_specs=pl.BlockSpec((TB, GD), lambda bi, gi: (bi, gi)),
            compiler_params=pltpu.CompilerParams(
                dimension_semantics=("parallel", "parallel"),
                vmem_limit_bytes=32 * 1024 * 1024,
            ),
        )(x_g, u_g, lo_d, inv_d, fmask_d, cfmask_d, last_d, bsel_d, W_d)

        # (B_pad, F_pad*d) -> (B, F, d): slice + contiguous reshape only.
        return out_p[:B, : F * d].reshape(B, F, d)

    return forward


def dice_embeddings(x, noise, Qs, lower_bounds, upper_bounds):
    """One-shot convenience wrapper (hot paths should reuse the factory)."""
    return make_dice_embeddings(Qs, lower_bounds, upper_bounds)(x, noise)


def dice_embeddings_ref(x, noise, Qs, lower_bounds, upper_bounds):
    """Pure-JAX reference (exact signed integer powers, like torch.pow)."""
    B, F = x.shape
    d = Qs.shape[-1]
    hp = jax.lax.Precision.HIGHEST
    outs = []
    for i in range(F):
        lo = lower_bounds[i]
        hi = upper_bounds[i]
        t = (x[:, i] - lo) / (hi - lo)
        t = jnp.where((t >= 0.0) & (t <= 1.0), t * jnp.pi, noise[:, i])
        s = jnp.sin(t)
        c = jnp.cos(t)
        pows = [jnp.ones_like(s)]
        for _ in range(1, d):
            pows.append(pows[-1] * s)
        cols = [c * pows[k] for k in range(d - 1)] + [pows[d - 1]]
        feats = jnp.stack(cols, axis=1)
        outs.append(jnp.dot(feats, Qs[i], precision=hp))
    return jnp.stack(outs, axis=1)


if __name__ == "__main__":
    B, F, d = 8, 4, 32

    key = jax.random.PRNGKey(0)
    k_m, k_x, k_u = jax.random.split(key, 3)

    # per-feature random Gaussian -> QR -> orthogonal Q (d, d)
    M = jax.random.normal(k_m, (F, d, d), dtype=jnp.float32)
    Qs, _ = jnp.linalg.qr(M)
    Qs = Qs.astype(jnp.float32)

    lower_bounds = jnp.array([0.0, -1.0, 2.0, -5.0], dtype=jnp.float32)
    upper_bounds = jnp.array([1.0, 1.0, 5.0, 5.0], dtype=jnp.float32)

    # inputs mostly inside [lower, upper] ...
    u01 = jax.random.uniform(k_x, (B, F), dtype=jnp.float32)
    x = lower_bounds[None, :] + (upper_bounds - lower_bounds)[None, :] * u01
    # ... plus a few out-of-range values to exercise the noise branch
    x = x.at[0, 0].set(upper_bounds[0] + 3.0)
    x = x.at[1, 2].set(lower_bounds[2] - 2.0)
    x = x.at[3, 1].set(upper_bounds[1] + 0.5)

    # TODO(synk): torch draws this uniform(-pi, pi) noise internally with
    # uniform_(); here it is a deterministic external input (could instead be
    # generated in-kernel with pltpu.prng_seed / prng_random_bits).
    noise = jax.random.uniform(
        k_u, (B, F), dtype=jnp.float32, minval=-math.pi, maxval=math.pi)
    # force negative angles on the out-of-range entries (negative sin powers)
    noise = noise.at[0, 0].set(-1.2345)
    noise = noise.at[1, 2].set(-2.5)

    dice = make_dice_embeddings(Qs, lower_bounds, upper_bounds)
    out = jax.block_until_ready(dice(x, noise))

    ref = dice_embeddings_ref(x, noise, Qs, lower_bounds, upper_bounds)
    assert out.shape == (B, F, d), out.shape
    assert bool(jnp.allclose(out, ref, atol=1e-3, rtol=1e-3)), "mismatch vs reference"

    print("KERNEL_OK")
</pallas_src>

<mosaic_0001>
module attributes {stable_mosaic.version = 11 : i64} {
  func.func @_dice_kernel(%arg0: i32, %arg1: i32, %arg2: memref<1x8x8xf32, #tpu.memory_space<vmem>>, %arg3: memref<1x8x8xf32, #tpu.memory_space<vmem>>, %arg4: memref<1x1x8xf32, #tpu.memory_space<vmem>>, %arg5: memref<1x1x8xf32, #tpu.memory_space<vmem>>, %arg6: memref<8x128xf32, #tpu.memory_space<vmem>>, %arg7: memref<8x128xf32, #tpu.memory_space<vmem>>, %arg8: memref<1x128xf32, #tpu.memory_space<vmem>>, %arg9: memref<5x128xf32, #tpu.memory_space<vmem>>, %arg10: memref<1x128x128xf32, #tpu.memory_space<vmem>>, %arg11: memref<8x128xf32, #tpu.memory_space<vmem>>) attributes {dimension_semantics = [#tpu.dimension_semantics<parallel>, #tpu.dimension_semantics<parallel>], iteration_bounds = array<i64: 1, 1>, scalar_prefetch = 0 : i64, scratch_operands = 0 : i64, tpu.core_type = #tpu.core_type<tc>, window_params = [{transform_indices = @transform_0, window_bounds = array<i64: 1, 8, 8>}, {transform_indices = @transform_1, window_bounds = array<i64: 1, 8, 8>}, {transform_indices = @transform_2, window_bounds = array<i64: 1, 1, 8>}, {transform_indices = @transform_3, window_bounds = array<i64: 1, 1, 8>}, {pipeline_mode = #tpu.pipeline_mode<synchronous>, transform_indices = @transform_4, window_bounds = array<i64: 8, 128>}, {pipeline_mode = #tpu.pipeline_mode<synchronous>, transform_indices = @transform_5, window_bounds = array<i64: 8, 128>}, {pipeline_mode = #tpu.pipeline_mode<synchronous>, transform_indices = @transform_6, window_bounds = array<i64: 1, 128>}, {pipeline_mode = #tpu.pipeline_mode<synchronous>, transform_indices = @transform_7, window_bounds = array<i64: 5, 128>}, {transform_indices = @transform_8, window_bounds = array<i64: 1, 128, 128>}, {transform_indices = @transform_9, window_bounds = array<i64: 8, 128>}]} {
    %c0 = arith.constant 0 : index
    %c0_0 = arith.constant 0 : index
    %c0_1 = arith.constant 0 : index
    %0 = vector.load %arg2[%c0, %c0_0, %c0_1] : memref<1x8x8xf32, #tpu.memory_space<vmem>>, vector<1x8x8xf32>
    %1 = vector.shape_cast %0 : vector<1x8x8xf32> to vector<8x8xf32>
    %c0_2 = arith.constant 0 : index
    %c0_3 = arith.constant 0 : index
    %c0_4 = arith.constant 0 : index
    %2 = vector.load %arg3[%c0_2, %c0_3, %c0_4] : memref<1x8x8xf32, #tpu.memory_space<vmem>>, vector<1x8x8xf32>
    %3 = vector.shape_cast %2 : vector<1x8x8xf32> to vector<8x8xf32>
    %c0_5 = arith.constant 0 : index
    %c0_6 = arith.constant 0 : index
    %c0_7 = arith.constant 0 : index
    %4 = vector.load %arg4[%c0_5, %c0_6, %c0_7] : memref<1x1x8xf32, #tpu.memory_space<vmem>>, vector<1x1x8xf32>
    %5 = vector.shape_cast %4 : vector<1x1x8xf32> to vector<1x8xf32>
    %c0_8 = arith.constant 0 : index
    %c0_9 = arith.constant 0 : index
    %c0_10 = arith.constant 0 : index
    %6 = vector.load %arg5[%c0_8, %c0_9, %c0_10] : memref<1x1x8xf32, #tpu.memory_space<vmem>>, vector<1x1x8xf32>
    %7 = vector.shape_cast %6 : vector<1x1x8xf32> to vector<1x8xf32>
    %8 = vector.broadcast %5 : vector<1x8xf32> to vector<8x8xf32>
    %9 = arith.subf %1, %8 : vector<8x8xf32>
    %10 = vector.broadcast %7 : vector<1x8xf32> to vector<8x8xf32>
    %11 = arith.mulf %9, %10 : vector<8x8xf32>
    %cst = arith.constant 0.000000e+00 : f32
    %12 = vector.broadcast %cst : f32 to vector<8x8xf32>
    %13 = arith.cmpf oge, %11, %12 : vector<8x8xf32>
    %cst_11 = arith.constant 1.000000e+00 : f32
    %14 = vector.broadcast %cst_11 : f32 to vector<8x8xf32>
    %15 = arith.cmpf ole, %11, %14 : vector<8x8xf32>
    %16 = arith.andi %13, %15 : vector<8x8xi1>
    %cst_12 = arith.constant 3.14159274 : f32
    %17 = vector.broadcast %cst_12 : f32 to vector<8x8xf32>
    %18 = arith.mulf %11, %17 : vector<8x8xf32>
    %19 = arith.select %16, %18, %3 : vector<8x8xi1>, vector<8x8xf32>
    %20 = math.sin %19 : vector<8x8xf32>
    %21 = math.cos %19 : vector<8x8xf32>
    %c0_13 = arith.constant 0 : index
    %c0_14 = arith.constant 0 : index
    %22 = vector.load %arg6[%c0_13, %c0_14] : memref<8x128xf32, #tpu.memory_space<vmem>>, vector<8x128xf32>
    %cst_15 = arith.constant dense<0.000000e+00> : vector<8x128xf32>
    %23 = tpu.matmul %20, %22, %cst_15 {dimension_numbers = #tpu.dot_dimension_numbers<[1], [0], [0], [1], [0, 0, 1, 1], [], []>, precision = #tpu.contract_precision<fp32>} : vector<8x8xf32>, vector<8x128xf32>, vector<8x128xf32> -> vector<8x128xf32>
    %c0_16 = arith.constant 0 : index
    %c0_17 = arith.constant 0 : index
    %24 = vector.load %arg7[%c0_16, %c0_17] : memref<8x128xf32, #tpu.memory_space<vmem>>, vector<8x128xf32>
    %cst_18 = arith.constant dense<0.000000e+00> : vector<8x128xf32>
    %25 = tpu.matmul %21, %24, %cst_18 {dimension_numbers = #tpu.dot_dimension_numbers<[1], [0], [0], [1], [0, 0, 1, 1], [], []>, precision = #tpu.contract_precision<fp32>} : vector<8x8xf32>, vector<8x128xf32>, vector<8x128xf32> -> vector<8x128xf32>
    %c0_19 = arith.constant 0 : index
    %c0_20 = arith.constant 0 : index
    %26 = vector.load %arg8[%c0_19, %c0_20] : memref<1x128xf32, #tpu.memory_space<vmem>>, vector<1x128xf32>
    %27 = vector.broadcast %26 : vector<1x128xf32> to vector<8x128xf32>
    %28 = arith.addf %25, %27 : vector<8x128xf32>
    %c0_21 = arith.constant 0 : index
    %c0_22 = arith.constant 0 : index
    %29 = vector.load %arg9[%c0_21, %c0_22] : memref<5x128xf32, #tpu.memory_space<vmem>>, vector<5x128xf32>
    %30 = vector.extract_strided_slice %29 {offsets = [0, 0], sizes = [1, 128], strides = [1, 1]} : vector<5x128xf32> to vector<1x128xf32>
    %cst_23 = arith.constant 5.000000e-01 : f32
    %31 = vector.broadcast %cst_23 : f32 to vector<1x128xf32>
    %32 = arith.cmpf ogt, %30, %31 : vector<1x128xf32>
    %cst_24 = arith.constant 1.000000e+00 : f32
    %33 = vector.broadcast %cst_24 : f32 to vector<8x128xf32>
    %34 = vector.shape_cast %32 : vector<1x128xi1> to vector<1x128xi1>
    %35 = vector.broadcast %34 : vector<1x128xi1> to vector<8x128xi1>
    %36 = arith.select %35, %23, %33 : vector<8x128xi1>, vector<8x128xf32>
    %37 = arith.mulf %23, %23 : vector<8x128xf32>
    %38 = vector.extract_strided_slice %29 {offsets = [1, 0], sizes = [1, 128], strides = [1, 1]} : vector<5x128xf32> to vector<1x128xf32>
    %cst_25 = arith.constant 5.000000e-01 : f32
    %39 = vector.broadcast %cst_25 : f32 to vector<1x128xf32>
    %40 = arith.cmpf ogt, %38, %39 : vector<1x128xf32>
    %41 = arith.mulf %36, %37 : vector<8x128xf32>
    %42 = vector.shape_cast %40 : vector<1x128xi1> to vector<1x128xi1>
    %43 = vector.broadcast %42 : vector<1x128xi1> to vector<8x128xi1>
    %44 = arith.select %43, %41, %36 : vector<8x128xi1>, vector<8x128xf32>
    %45 = arith.mulf %37, %37 : vector<8x128xf32>
    %46 = vector.extract_strided_slice %29 {offsets = [2, 0], sizes = [1, 128], strides = [1, 1]} : vector<5x128xf32> to vector<1x128xf32>
    %cst_26 = arith.constant 5.000000e-01 : f32
    %47 = vector.broadcast %cst_26 : f32 to vector<1x128xf32>
    %48 = arith.cmpf ogt, %46, %47 : vector<1x128xf32>
    %49 = arith.mulf %44, %45 : vector<8x128xf32>
    %50 = vector.shape_cast %48 : vector<1x128xi1> to vector<1x128xi1>
    %51 = vector.broadcast %50 : vector<1x128xi1> to vector<8x128xi1>
    %52 = arith.select %51, %49, %44 : vector<8x128xi1>, vector<8x128xf32>
    %53 = arith.mulf %45, %45 : vector<8x128xf32>
    %54 = vector.extract_strided_slice %29 {offsets = [3, 0], sizes = [1, 128], strides = [1, 1]} : vector<5x128xf32> to vector<1x128xf32>
    %cst_27 = arith.constant 5.000000e-01 : f32
    %55 = vector.broadcast %cst_27 : f32 to vector<1x128xf32>
    %56 = arith.cmpf ogt, %54, %55 : vector<1x128xf32>
    %57 = arith.mulf %52, %53 : vector<8x128xf32>
    %58 = vector.shape_cast %56 : vector<1x128xi1> to vector<1x128xi1>
    %59 = vector.broadcast %58 : vector<1x128xi1> to vector<8x128xi1>
    %60 = arith.select %59, %57, %52 : vector<8x128xi1>, vector<8x128xf32>
    %61 = arith.mulf %53, %53 : vector<8x128xf32>
    %62 = vector.extract_strided_slice %29 {offsets = [4, 0], sizes = [1, 128], strides = [1, 1]} : vector<5x128xf32> to vector<1x128xf32>
    %cst_28 = arith.constant 5.000000e-01 : f32
    %63 = vector.broadcast %cst_28 : f32 to vector<1x128xf32>
    %64 = arith.cmpf ogt, %62, %63 : vector<1x128xf32>
    %65 = arith.mulf %60, %61 : vector<8x128xf32>
    %66 = vector.shape_cast %64 : vector<1x128xi1> to vector<1x128xi1>
    %67 = vector.broadcast %66 : vector<1x128xi1> to vector<8x128xi1>
    %68 = arith.select %67, %65, %60 : vector<8x128xi1>, vector<8x128xf32>
    %69 = arith.mulf %68, %28 : vector<8x128xf32>
    %c0_29 = arith.constant 0 : index
    %c0_30 = arith.constant 0 : index
    %c0_31 = arith.constant 0 : index
    %70 = vector.load %arg10[%c0_29, %c0_30, %c0_31] : memref<1x128x128xf32, #tpu.memory_space<vmem>>, vector<1x128x128xf32>
    %71 = vector.shape_cast %70 : vector<1x128x128xf32> to vector<128x128xf32>
    %cst_32 = arith.constant dense<0.000000e+00> : vector<8x128xf32>
    %72 = tpu.matmul %69, %71, %cst_32 {dimension_numbers = #tpu.dot_dimension_numbers<[1], [0], [0], [1], [0, 0, 1, 1], [], []>, precision = #tpu.contract_precision<fp32>} : vector<8x128xf32>, vector<128x128xf32>, vector<8x128xf32> -> vector<8x128xf32>
    %c0_33 = arith.constant 0 : index
    %c0_34 = arith.constant 0 : index
    %73 = vector.load %arg11[%c0_33, %c0_34] : memref<8x128xf32, #tpu.memory_space<vmem>>, vector<8x128xf32>
    tpu.vector_store %arg11[%c0_33, %c0_34], %72 {strides = array<i32>} : memref<8x128xf32, #tpu.memory_space<vmem>>, vector<8x128xf32>,
    return
  }
  func.func @transform_0(%arg0: i32, %arg1: i32) -> (i32, i32, i32) {
    %c0_i32 = arith.constant 0 : i32
    %c0_i32_0 = arith.constant 0 : i32
    return %arg1, %arg0, %c0_i32 : i32, i32, i32
  }
  func.func @transform_1(%arg0: i32, %arg1: i32) -> (i32, i32, i32) {
    %c0_i32 = arith.constant 0 : i32
    %c0_i32_0 = arith.constant 0 : i32
    return %arg1, %arg0, %c0_i32 : i32, i32, i32
  }
  func.func @transform_2(%arg0: i32, %arg1: i32) -> (i32, i32, i32) {
    %c0_i32 = arith.constant 0 : i32
    %c0_i32_0 = arith.constant 0 : i32
    %c0_i32_1 = arith.constant 0 : i32
    return %arg1, %c0_i32, %c0_i32_0 : i32, i32, i32
  }
  func.func @transform_3(%arg0: i32, %arg1: i32) -> (i32, i32, i32) {
    %c0_i32 = arith.constant 0 : i32
    %c0_i32_0 = arith.constant 0 : i32
    %c0_i32_1 = arith.constant 0 : i32
    return %arg1, %c0_i32, %c0_i32_0 : i32, i32, i32
  }
  func.func @transform_4(%arg0: i32, %arg1: i32) -> (i32, i32) {
    %c0_i32 = arith.constant 0 : i32
    %c0_i32_0 = arith.constant 0 : i32
    %c0_i32_1 = arith.constant 0 : i32
    return %c0_i32, %c0_i32_0 : i32, i32
  }
  func.func @transform_5(%arg0: i32, %arg1: i32) -> (i32, i32) {
    %c0_i32 = arith.constant 0 : i32
    %c0_i32_0 = arith.constant 0 : i32
    %c0_i32_1 = arith.constant 0 : i32
    return %c0_i32, %c0_i32_0 : i32, i32
  }
  func.func @transform_6(%arg0: i32, %arg1: i32) -> (i32, i32) {
    %c0_i32 = arith.constant 0 : i32
    %c0_i32_0 = arith.constant 0 : i32
    %c0_i32_1 = arith.constant 0 : i32
    return %c0_i32, %c0_i32_0 : i32, i32
  }
  func.func @transform_7(%arg0: i32, %arg1: i32) -> (i32, i32) {
    %c0_i32 = arith.constant 0 : i32
    %c0_i32_0 = arith.constant 0 : i32
    %c0_i32_1 = arith.constant 0 : i32
    return %c0_i32, %c0_i32_0 : i32, i32
  }
  func.func @transform_8(%arg0: i32, %arg1: i32) -> (i32, i32, i32) {
    %c0_i32 = arith.constant 0 : i32
    %c0_i32_0 = arith.constant 0 : i32
    %c0_i32_1 = arith.constant 0 : i32
    return %arg1, %c0_i32, %c0_i32_0 : i32, i32, i32
  }
  func.func @transform_9(%arg0: i32, %arg1: i32) -> (i32, i32) {
    %c0_i32 = arith.constant 0 : i32
    return %arg0, %arg1 : i32, i32
  }
}

</mosaic_0001>

<bundles_post_ra>
// kernel: forward.1
= control target key start
LH: loop header
LB: loop body
LE: loop exit
PB: predicated region body
PF: predicated region fallthrough
CT: control target
= control target key end

     0   :  { %14 = vsyncpa [#allocation3], 0  ;;  %s1114_s12 = smov [#allocation2]   ;;  %s1115_s14 = smov 128   ;;  %s1520_s0 = inlined_call_operand.vmem [shape: f32[1,8,8], index: 0, kind: input, shape index: {}]   ;;  %s1521_s1 = inlined_call_operand.vmem [shape: f32[1,8,8], index: 1, kind: input, shape index: {}]   ;;  %s1522_s2 = inlined_call_operand.vmem [shape: f32[1,1,8], index: 2, kind: input, shape index: {}]   ;;  %s1523_s3 = inlined_call_operand.vmem [shape: f32[1,1,8], index: 3, kind: input, shape index: {}]   ;;  %s1524_s4 = inlined_call_operand.vmem [shape: f32[8,128], index: 4, kind: input, shape index: {}]   ;;  %s1525_s5 = inlined_call_operand.vmem [shape: f32[8,128], index: 5, kind: input, shape index: {}]   ;;  %s1526_s6 = inlined_call_operand.vmem [shape: f32[1,128], index: 6, kind: input, shape index: {}]   ;;  %s1527_s7 = inlined_call_operand.vmem [shape: f32[5,128], index: 7, kind: input, shape index: {}]   ;;  %s1528_s8 = inlined_call_operand.hbm [shape: f32[1,128,128], index: 8, kind: input, shape index: {}]   ;;  %s1529_s9 = inlined_call_operand.vmem [shape: f32[8,128], index: 9, kind: output, shape index: {}]  }
   0x1   :  { %s35_s11 = sshll.u32 %s1528_s8, 4  ;;  %s37_s13 = sshll.u32 %s1114_s12, 4  ;;  %s36_s11 = int_to_ptr.hbm [resolvable:$true] %s35_s11  ;;  %s38_s13 = int_to_ptr.vmem [resolvable:$true] %s37_s13 }
   0x2   :  { %s1116_s15 = smov 8  }
   0x3   :  { %43 = dma.hbm_to_vmem [thread:$0]  %s36_s11, 2048, %s38_s13, [#allocation3], %s1115_s14, %s1115_s14, %s1116_s15  }
   0x4   :  { %1112 = dma.done.wait [#allocation3], 2048  }
   0x5   :  { %1113 = vsyncadd [#allocation3], 4294965248  ;;  %v374_v0 = vld [vmem:[%s1524_s4] sm:$0xff]  ;;  %v1117_v25 = vmov 683565275  }
   0x6   :  { %v1180_v1 = vand.u32 4294901760, %v374_v0  ;;  %v48_v2 = vld [vmem:[%s1520_s0] sm:$0xff]  ;;  %v1118_v27 = vmov 2475754826   ;;  %v1119_v29 = vmov 2131351028  }
   0x7   :  { %v1085_v3 = vld [vmem:[%s1522_s2] ss:$0 sm:$0xff]  ;;  %v1120_v31 = vmov 2102212464   ;;  %v1121_v33 = vmov 920167782  }
   0x8   :  { %v1086_v4 = vld [vmem:[%s1523_s3] ss:$0 sm:$0xff]  ;;  %395 = vmatpush.msra.mxu2 %v1180_v1  ;;  %v1193_v5 = vsub.f32 %v374_v0, %v1180_v1  ;;  %v55_v6 = vsub.f32 %v48_v2, %v1085_v3  ;;  %v1122_v39 = vmov 1326507024  }
   0x9   :  { %v49_v10 = vld [vmem:[%s1521_s1] sm:$0xff] }
   0xa   :  { %v422_v7 = vand.u32 4294901760, %v1193_v5  ;;  %448 = vmatpush.msrb.mxu2 %v1193_v5  ;;  %v59_v8 = vmul.f32 %v1086_v4, %v55_v6 }
   0xc   :  { %v423_v9 = vsub.f32 %v1193_v5, %v422_v7  ;;  %vm60_vm0 = vcmp.ge.f32.partialorder %v59_v8, 0.0  ;;  %vm61_vm1 = vcmp.le.f32.partialorder %v59_v8, 1.0  ;;  %v63_v11 = vmul.f32 3.1415927, %v59_v8 }
   0xd   :  { %vm62_vm2 = vmand %vm60_vm0, %vm61_vm1 }
   0xe   :  { %v424_v12 = vand.u32 4294901760, %v423_v9  ;;  %v1203_v13 = vsel %vm62_vm2, %v63_v11, %v49_v10 }
   0xf   :  { %v68_v14 = vand.u32 2139095040, %v1203_v13  ;;  %v65_v16 = vand.u32 2147483647, %v1203_v13  ;;  %vm67_vm15 = vcmp.lt.s32.totalorder %v1203_v13, 0 }
  0x10   :  { %425 = vmatpush.msra.mxu3 %v424_v12 }
  0x11   :  { %v69_v15 = vshrl.u32 %v68_v14, 23  ;;  %v72_v19 = vand.u32 8388607, %v65_v16  ;;  %vm66_vm0 = vcmp.le.f32.partialorder %v65_v16, 0.7853982 }
  0x12   :  { %471 = vmatpush.msrb.mxu3 %v1180_v1 }
  0x13   :  { %v1069_v17 = vadd.s32 4294967169, %v69_v15  ;;  %v73_v22 = vor.u32 8388608, %v72_v19 }
  0x15   :  { %v75_v18 = vadd.s32 1, %v1069_v17  ;;  %v1213_v41 = vshll.u32 %v73_v22, 8 }
  0x17   :  { %vm76_vm3 = vcmp.gt.s32.totalorder %v75_v18, 0  ;;  %v114_v53 = vand.u32 65535, %v1213_v41  ;;  %v115_v54 = vshrl.u32 %v1213_v41, 16 }
  0x18   :  { %v77_v20 = vsel %vm76_vm3, %v75_v18, 0  ;;  %v1123_v18 = vmov 0  }
  0x19   :  { %v79_v21 = vand.u32 31, %v77_v20  ;;  %v1210_v23 = vshrl.u32 %v77_v20, 5 }
  0x1b   :  { %v80_v24 = vsub.s32 32, %v79_v21  ;;  %v82_v26 = vshll.u32 %v1117_v25, %v79_v21  ;;  %v85_v28 = vshll.u32 %v1118_v27, %v79_v21  ;;  %v88_v30 = vshll.u32 %v1119_v29, %v79_v21 }
  0x1c   :  { %v91_v32 = vshll.u32 %v1120_v31, %v79_v21  ;;  %v94_v34 = vshll.u32 %v1121_v33, %v79_v21  ;;  %vm97_vm4 = vcmp.lt.s32.totalorder %v1210_v23, 1  ;;  %vm100_vm5 = vcmp.lt.s32.totalorder %v1210_v23, 4 }
  0x1d   :  { %v83_v35 = vshrl.u32 %v1118_v27, %v80_v24  ;;  %v86_v36 = vshrl.u32 %v1119_v29, %v80_v24  ;;  %v89_v37 = vshrl.u32 %v1120_v31, %v80_v24  ;;  %v92_v38 = vshrl.u32 %v1121_v33, %v80_v24 }
  0x1e   :  { %v95_v40 = vshrl.u32 %v1122_v39, %v80_v24  ;;  %vm99_vm6 = vcmp.lt.s32.totalorder %v1210_v23, 3  ;;  %vm98_vm7 = vcmp.lt.s32.totalorder %v1210_v23, 2  ;;  %v81_v61 = vshrl.u32 %v1117_v25, %v80_v24 }
  0x1f   :  { %v84_v42 = vor.u32 %v83_v35, %v82_v26  ;;  %v87_v43 = vor.u32 %v86_v36, %v85_v28  ;;  %v90_v44 = vor.u32 %v89_v37, %v88_v30  ;;  %v93_v45 = vor.u32 %v92_v38, %v91_v32 }
  0x20   :  { %v96_v46 = vor.u32 %v95_v40, %v94_v34 }
  0x21   :  { %v105_v47 = vsel %vm97_vm4, %v84_v42, %v87_v43  ;;  %v109_v48 = vsel %vm97_vm4, %v87_v43, %v90_v44  ;;  %v106_v49 = vsel %vm100_vm5, %v93_v45, 920167782  ;;  %v101_v14 = vsel %vm97_vm4, %v81_v61, %v84_v42 }
  0x22   :  { %v110_v50 = vsel %vm100_vm5, %v96_v46, 1326507024  ;;  %v107_v51 = vsel %vm99_vm6, %v90_v44, %v106_v49  ;;  %v102_v17 = vsel %vm100_vm5, %v90_v44, 2102212464 }
  0x23   :  { %v111_v52 = vsel %vm99_vm6, %v93_v45, %v110_v50  ;;  %v108_v55 = vsel %vm98_vm7, %v105_v47, %v107_v51  ;;  %v103_v28 = vsel %vm99_vm6, %v87_v43, %v102_v17 }
  0x24   :  { %v112_v56 = vsel %vm98_vm7, %v109_v48, %v111_v52  ;;  %v138_v59 = vand.u32 65535, %v108_v55  ;;  %v139_v60 = vshrl.u32 %v108_v55, 16  ;;  %v104_v36 = vsel %vm98_vm7, %v101_v14, %v103_v28 }
  0x25   :  { %v116_v57 = vand.u32 65535, %v112_v56  ;;  %v117_v58 = vshrl.u32 %v112_v56, 16  ;;  %v158_v40 = vmul.u32 %v1213_v41, %v104_v36  ;;  %vm208_vm7 = vweird.f32 %v1203_v13 }
  0x26   :  { %v140_v2 = vmul.u32 %v138_v59, %v114_v53  ;;  %v141_v3 = vmul.u32 %v139_v60, %v114_v53  ;;  %v142_v4 = vmul.u32 %v138_v59, %v115_v54  ;;  %v143_v10 = vmul.u32 %v139_v60, %v115_v54 }
  0x27   :  { %v118_v62 = vmul.u32 %v116_v57, %v114_v53  ;;  %v119_v63 = vmul.u32 %v117_v58, %v114_v53  ;;  %v120_v0 = vmul.u32 %v116_v57, %v115_v54  ;;  %v121_v6 = vmul.u32 %v117_v58, %v115_v54 }
  0x28   :  { %v144_v11 = vshll.u32 %v141_v3, 16  ;;  %v146_v12 = vshll.u32 %v142_v4, 16  ;;  %v145_v26 = vshrl.u32 %v141_v3, 16  ;;  %v147_v32 = vshrl.u32 %v142_v4, 16 }
  0x29   :  { %v122_v8 = vshll.u32 %v119_v63, 16  ;;  %v124_v9 = vshll.u32 %v120_v0, 16  ;;  %v123_v21 = vshrl.u32 %v119_v63, 16  ;;  %v125_v29 = vshrl.u32 %v120_v0, 16 }
  0x2a   :  { %vm148_vm9 = vc.u32 %v140_v2, %v144_v11  ;;  %v150_v20 = vadd.s32 %v144_v11, %v140_v2 }
  0x2b   :  { %vm126_vm8 = vc.u32 %v118_v62, %v122_v8  ;;  %v128_v15 = vadd.s32 %v122_v8, %v118_v62  ;;  %v149_v24 = vsel %vm148_vm9, 1, %v1123_v18 }
  0x2c   :  { %v127_v19 = vsel %vm126_vm8, 1, %v1123_v18  ;;  %v151_v27 = vadd.s32 %v149_v24, %v143_v10  ;;  %vm152_vm11 = vc.u32 %v150_v20, %v146_v12  ;;  %v154_v35 = vadd.s32 %v150_v20, %v146_v12 }
  0x2d   :  { %v129_v22 = vadd.s32 %v127_v19, %v121_v6  ;;  %vm130_vm10 = vc.u32 %v128_v15, %v124_v9  ;;  %v153_v31 = vsel %vm152_vm11, 1, %v1123_v18  ;;  %vm375_vm8 = vcmask 64512  }
  0x2e   :  { %v131_v25 = vsel %vm130_vm10, 1, %v1123_v18  ;;  %v155_v33 = vadd.s32 %v153_v31, %v151_v27 }
  0x2f   :  { %v133_v30 = vadd.s32 %v131_v25, %v129_v22 }
  0x30   :  { %v156_v37 = vadd.s32 %v155_v33, %v145_v26 }
  0x31   :  { %v134_v34 = vadd.s32 %v133_v30, %v123_v21  ;;  %v525_v30 = vld [vmem:[%s1525_s5] sm:$0xff] }
  0x32   :  { %v157_v39 = vadd.s32 %v156_v37, %v147_v32  ;;  %v1256_v31 = vand.u32 4294901760, %v525_v30 }
  0x33   :  { %v135_v38 = vadd.s32 %v134_v34, %v125_v29 }
  0x34   :  { %v161_v42 = vadd.s32 1, %v157_v39  ;;  %625 = vmatpush.msra.mxu1 %v1256_v31 }
  0x35   :  { %vm160_vm12 = vc.u32 %v135_v38, %v154_v35  ;;  %v159_v23 = vadd.s32 %v154_v35, %v135_v38  ;;  %v1260_v35 = vsub.f32 %v525_v30, %v1256_v31 }
  0x36   :  { %v162_v44 = vsel %vm160_vm12, %v161_v42, %v157_v39 }
  0x37   :  { %v163_v43 = vadd.s32 %v162_v44, %v158_v40  ;;  %602 = vmatpush.msra.mxu0 %v1260_v35 }
  0x39   :  { %v164_v45 = vadd.s32 536870912, %v163_v43 }
  0x3b   :  { %v165_v46 = vshrl.u32 %v164_v45, 30  ;;  %v576_v45 = vand.u32 4294901760, %v1260_v35 }
  0x3d   :  { %v166_v47 = vshll.u32 %v165_v46, 30  ;;  %v189_v0 = vsub.s32 4, %v165_v46 }
  0x3f   :  { %v167_v48 = vsub.s32 %v163_v43, %v166_v47  ;;  %v190_v4 = vsel %vm67_vm15, %v189_v0, %v165_v46  ;;  %v715_v0 = vld [vmem:[#allocation2 + $0x48] sm:$0xff] }
  0x40   :  { %v192_v9 = vsel %vm66_vm0, 0, %v190_v4 }
  0x41   :  { %vm168_vm13 = vcmp.lt.s32.totalorder %v167_v48, 0  ;;  %v169_v49 = vsub.s32 0, %v167_v48  ;;  %v209_v15 = vadd.s32 3, %v192_v9  ;;  %v364_v24 = vand.u32 3, %v192_v9 }
  0x43   :  { %v170_v50 = vsel %vm168_vm13, %v169_v49, %v167_v48  ;;  %v210_v22 = vand.u32 3, %v209_v15  ;;  %vm369_vm2 = vcmp.eq.s32.totalorder %v364_v24, 2  ;;  %vm366_vm5 = vcmp.eq.s32.totalorder %v364_v24, 0 }
  0x44   :  { %v171_v51 = vclz %v170_v50  ;;  %vm365_vm6 = vcmp.lt.s32.totalorder %v364_v24, 2  ;;  %v577_v49 = vsub.f32 %v1260_v35, %v576_v45  ;;  %v714_v35 = vld [vmem:[#allocation2 + $0x40] sm:$0xff] }
  0x45   :  { %vm215_vm1 = vcmp.eq.s32.totalorder %v210_v22, 2  ;;  %vm211_vm3 = vcmp.lt.s32.totalorder %v210_v22, 2  ;;  %vm212_vm4 = vcmp.eq.s32.totalorder %v210_v22, 0 }
  0x46   :  { %v1070_v52 = vadd.s32 4294967294, %v171_v51 }
  0x48   :  { %vm1071_vm14 = vcmp.lt.s32.totalorder %v1070_v52, 0 }
  0x49   :  { %v174_v53 = vsel %vm1071_vm14, 0, %v1070_v52 }
  0x4a   :  { %v175_v54 = vsub.s32 32, %v174_v53  ;;  %v176_v55 = vshll.u32 %v167_v48, %v174_v53  ;;  %v179_v56 = vsub.s32 4294967266, %v174_v53 }
  0x4c   :  { %v177_v41 = vshrl.u32 %v159_v23, %v175_v54  ;;  %v180_v57 = vadd.s32 127, %v179_v56  ;;  %v578_v23 = vand.u32 4294901760, %v577_v49  ;;  %v721_v54 = vld [vmem:[#allocation2 + $0x78] sm:$0xff] }
  0x4d   :  { %v1284_v56 = vand.u32 4294901760, %v721_v54 }
  0x4e   :  { %v178_v58 = vor.u32 %v177_v41, %v176_v55  ;;  %v181_v59 = vshll.u32 %v180_v57, 23  ;;  %v720_v55 = vld [vmem:[#allocation2 + $0x70] sm:$0xff] }
  0x4f   :  { %v1286_v41 = vand.u32 4294901760, %v720_v55  ;;  %v1297_v5 = vsub.f32 %v721_v54, %v1284_v56  ;;  %723 = vmatpush.msrb.mxu0 %v1284_v56 }
  0x50   :  { %v182_v60 = vor.u32 4788187, %v181_v59  ;;  %v185_v61 = vcvt.s32.f32 %v178_v58  ;;  %v718_v58 = vld [vmem:[#allocation2 + $0x60] sm:$0xff]  ;;  %v717_v59 = vld [vmem:[#allocation2 + $0x58] sm:$0xff] }
  0x51   :  { %725 = vmatpush.msrb.mxu0 %v1286_v41 }
  0x52   :  { %v183_v62 = vand.u32 2147483647, %v182_v60  ;;  %v716_v60 = vld [vmem:[#allocation2 + $0x50] sm:$0xff] }
  0x54   :  { %v186_v63 = vmul.f32 %v185_v61, %v183_v62  ;;  %v1290_v61 = vand.u32 4294901760, %v718_v58  ;;  %v1292_v62 = vand.u32 4294901760, %v717_v59 }
  0x56   :  { %v187_v2 = vxor.u32 2147483648, %v186_v63  ;;  %v1309_v4 = vsub.f32 %v718_v58, %v1290_v61 }
  0x58   :  { %v188_v3 = vsel %vm67_vm15, %v187_v2, %v186_v63  ;;  %v1294_v63 = vand.u32 4294901760, %v716_v60 }
  0x59   :  { %v191_v6 = vsel %vm66_vm0, %v1203_v13, %v188_v3  ;;  %v1306_v3 = vand.u32 4294901760, %v715_v0 }
  0x5a   :  { %v193_v8 = vmul.f32 %v191_v6, %v191_v6 }
  0x5c   :  { %v194_v10 = vmul.f32 -0.001358992, %v193_v8  ;;  %v201_v11 = vmul.f32 -0.00019511016, %v193_v8 }
  0x5e   :  { %v195_v12 = vadd.f32 0.041655596, %v194_v10  ;;  %v202_v14 = vadd.f32 0.008332121, %v201_v11  ;;  %v1319_v11 = vsub.f32 %v716_v60, %v1294_v63 }
  0x60   :  { %v196_v17 = vmul.f32 %v195_v12, %v193_v8  ;;  %v203_v19 = vmul.f32 %v202_v14, %v193_v8  ;;  %v783_v12 = vand.u32 4294901760, %v1309_v4  ;;  %v1323_v14 = vsub.f32 %v715_v0, %v1306_v3 }
  0x62   :  { %v197_v20 = vadd.f32 -0.4999988, %v196_v17  ;;  %v204_v21 = vadd.f32 -0.16666654, %v203_v19  ;;  %v784_v24 = vsub.f32 %v1309_v4, %v783_v12 }
  0x64   :  { %v198_v25 = vmul.f32 %v197_v20, %v193_v8  ;;  %v205_v16 = vmul.f32 %v204_v21, %v193_v8  ;;  %v765_v8 = vand.u32 4294901760, %v1297_v5 }
  0x66   :  { %v199_v26 = vadd.f32 1.0, %v198_v25  ;;  %v206_v27 = vadd.f32 1.0, %v205_v16  ;;  %v766_v15 = vsub.f32 %v1297_v5, %v765_v8  ;;  %v795_v25 = vand.u32 4294901760, %v1319_v11 }
  0x68   :  { %v207_v28 = vmul.f32 %v206_v27, %v191_v6  ;;  %v216_v29 = vxor.u32 2147483648, %v199_v26  ;;  %v1312_v6 = vsub.f32 %v717_v59, %v1292_v62  ;;  %v767_v21 = vand.u32 4294901760, %v766_v15  ;;  %v708_v15 = vld [vmem:[#allocation2 + $0x10] sm:$0xff] }
  0x69   :  { %v801_v27 = vand.u32 4294901760, %v1323_v14 }
  0x6a   :  { %v213_v32 = vxor.u32 2147483648, %v207_v28  ;;  %v217_v33 = vsel %vm215_vm1, %v216_v29, %v207_v28  ;;  %v371_v34 = vsel %vm369_vm2, %v216_v29, %v207_v28  ;;  %v789_v20 = vand.u32 4294901760, %v1312_v6  ;;  %768 = vmatpush.msrb.mxu1 %v767_v21 }
  0x6b   :  { %v785_v28 = vand.u32 4294901760, %v784_v24  ;;  %v796_v29 = vsub.f32 %v1319_v11, %v795_v25 }
  0x6c   :  { %v214_v36 = vsel %vm212_vm4, %v199_v26, %v213_v32  ;;  %v368_v37 = vsel %vm366_vm5, %v199_v26, %v213_v32  ;;  %v790_v26 = vsub.f32 %v1312_v6, %v789_v20 }
  0x6d   :  { %v218_v38 = vsel %vm211_vm3, %v214_v36, %v217_v33  ;;  %v372_v39 = vsel %vm365_vm6, %v368_v37, %v371_v34  ;;  %v797_v33 = vand.u32 4294901760, %v796_v29  ;;  %v1380_v37 = vand.u32 4294901760, %v714_v35 }
  0x6e   :  { %v219_v40 = vsel %vm208_vm7, nan, %v218_v38  ;;  %v373_v42 = vsel %vm208_vm7, nan, %v372_v39  ;;  %v791_v30 = vand.u32 4294901760, %v790_v26  ;;  %v713_v38 = vld [vmem:[#allocation2 + $0x38] sm:$0xff] }
  0x6f   :  { %v377_v44 = vsel %vm375_vm8, %v219_v40, 0  ;;  %v531_v43 = vsel %vm375_vm8, %v373_v42, 0  ;;  %v1383_v39 = vsub.f32 %v714_v35, %v1380_v37  ;;  %v1385_v40 = vand.u32 4294901760, %v713_v38  ;;  %v712_v42 = vld [vmem:[#allocation2 + $0x30] sm:$0xff] }
  0x70   :  { %v1265_v46 = vand.u32 4294901760, %v377_v44  ;;  %v1267_v13 = vand.u32 4294901760, %v531_v43 }
  0x72   :  { %v397_v47 = vsub.f32 %v377_v44, %v1265_v46  ;;  %v1271_v48 = vsub.f32 %v531_v43, %v1267_v13  ;;  %427 = vmatmul.f32.vlgmr.msra.gmra.mxu3 %v1265_v46  ;;  %v807_v44 = vand.u32 4294901760, %v1383_v39  ;;  %v1391_v43 = vsub.f32 %v713_v38, %v1385_v40 }
  0x73   :  { %519 = vmatpush.msra.mxu3 %v1180_v1  ;;  %v719_v1 = vld [vmem:[#allocation2 + $0x68] sm:$0xff] }
  0x74   :  { %v398_v50 = vand.u32 4294901760, %v397_v47  ;;  %v552_v51 = vand.u32 4294901760, %v1271_v48  ;;  %605 = vmatmul.f32.vlgmr.msra.gmra.mxu0 %v1271_v48  ;;  %v1288_v57 = vand.u32 4294901760, %v719_v1 }
  0x76   :  { %v399_v52 = vsub.f32 %v397_v47, %v398_v50  ;;  %629 = vmatmul.f32.vlgmr.msra.gmra.mxu1 %v552_v51  ;;  %v1303_v2 = vsub.f32 %v719_v1, %v1288_v57  ;;  %727 = vmatpush.msrb.mxu0 %v1288_v57  ;;  %v553_v32 = vsub.f32 %v1271_v48, %v552_v51 }
  0x78   :  { %v400_v53 = vand.u32 4294901760, %v399_v52  ;;  %v777_v10 = vand.u32 4294901760, %v1303_v2  ;;  %729 = vmatpush.msrb.mxu0 %v1290_v61  ;;  %v554_v36 = vand.u32 4294901760, %v553_v32  ;;  %v706_v32 = vld [vmem:[#allocation2] sm:$0xff] }
  0x79   :  { %v1460_v35 = vand.u32 4294901760, %v706_v32 }
  0x7a   :  { %401 = vmatmul.f32.vlgmr.msra.gmra.mxu2 %v400_v53  ;;  %475 = vmatmul.f32.vlgmr.msrb.gmra.mxu3 %v398_v50  ;;  %v778_v19 = vsub.f32 %v1303_v2, %v777_v10  ;;  %v710_v50 = vld [vmem:[#allocation2 + $0x20] sm:$0xff] }
  0x7b   :  { %497 = vmatpush.msra.mxu2 %v422_v7  ;;  %579 = vmatpush.msrb.mxu3 %v578_v23  ;;  %v1300_v7 = vsub.f32 %v720_v55, %v1286_v41  ;;  %v1419_v54 = vand.u32 4294901760, %v710_v50  ;;  %v709_v55 = vld [vmem:[#allocation2 + $0x18] sm:$0xff] }
  0x7c   :  { %v779_v16 = vand.u32 4294901760, %v778_v19  ;;  %731 = vmatpush.msrb.mxu0 %v1292_v62  ;;  %v1426_v60 = vand.u32 4294901760, %v709_v55 }
  0x7d   :  { %v771_v9 = vand.u32 4294901760, %v1300_v7  ;;  %v1430_v0 = vsub.f32 %v710_v50, %v1419_v54  ;;  %v854_v50 = vsub.f32 %v706_v32, %v1460_v35 }
  0x7e   :  { %733 = vmatpush.msrb.mxu0 %v1294_v63  ;;  %v1438_v21 = vsub.f32 %v709_v55, %v1426_v60 }
  0x7f   :  { %v772_v17 = vsub.f32 %v1300_v7, %v771_v9  ;;  %v831_v24 = vand.u32 4294901760, %v1430_v0  ;;  %v855_v55 = vand.u32 4294901760, %v854_v50 }
  0x80   :  { %735 = vmatpush.msrb.mxu0 %v1306_v3 }
  0x81   :  { %v773_v22 = vand.u32 4294901760, %v772_v17 }
  0x82   :  { %451 = vmatmul.f32.vlgmr.msrb.gmra.mxu2 %v397_v47  ;;  %521 = vmatmul.f32.vlgmr.msra.gmra.mxu3 %v1265_v46  ;;  %v813_v47 = vand.u32 4294901760, %v1391_v43 }
  0x83   :  { %549 = vmatpush.msrb.mxu2 %v1256_v31  ;;  %673 = vmatpush.msra.mxu3 %v1256_v31  ;;  %v802_v31 = vsub.f32 %v1323_v14, %v801_v27 }
  0x84   :  { %774 = vmatpush.msrb.mxu1 %v773_v22  ;;  %737 = vmatpush.msrb.mxu0 %v1380_v37  ;;  %v814_v52 = vsub.f32 %v1391_v43, %v813_v47  ;;  %v1440_v22 = vand.u32 4294901760, %v708_v15 }
  0x85   :  { %v803_v34 = vand.u32 4294901760, %v802_v31  ;;  %v832_v31 = vsub.f32 %v1430_v0, %v831_v24 }
  0x86   :  { %780 = vmatpush.msrb.mxu1 %v779_v16  ;;  %739 = vmatpush.msrb.mxu0 %v1385_v40  ;;  %v815_v1 = vand.u32 4294901760, %v814_v52  ;;  %v707_v16 = vld [vmem:[#allocation2 + $0x8] sm:$0xff]  ;;  %v1447_v29 = vsub.f32 %v708_v15, %v1440_v22 }
  0x87   :  { %v833_v38 = vand.u32 4294901760, %v832_v31 }
  0x88   :  { %786 = vmatpush.msrb.mxu1 %v785_v28  ;;  %v837_v28 = vand.u32 4294901760, %v1438_v21 }
  0x8a   :  { %499 = vmatmul.f32.vlgmr.msra.gmra.mxu2 %v1265_v46  ;;  %581 = vmatmul.f32.vlgmr.msrb.gmra.mxu3 %v1267_v13  ;;  %v711_v46 = vld [vmem:[#allocation2 + $0x28] sm:$0xff] }
  0x8b   :  { %651 = vmatpush.msra.mxu2 %v576_v45  ;;  %919 = vmatpush.msrb.mxu3 %v1284_v56  ;;  %v1393_v45 = vand.u32 4294901760, %v712_v42  ;;  %v1405_v49 = vand.u32 4294901760, %v711_v46 }
  0x8c   :  { %792 = vmatpush.msrb.mxu1 %v791_v30  ;;  %v1449_v30 = vand.u32 4294901760, %v707_v16 }
  0x8d   :  { %921 = vmatpush.msrb.mxu3 %v1286_v41  ;;  %v1403_v48 = vsub.f32 %v712_v42, %v1393_v45  ;;  %741 = vmatpush.msrb.mxu0 %v1393_v45  ;;  %v1415_v53 = vsub.f32 %v711_v46, %v1405_v49 }
  0x8e   :  { %798 = vmatpush.msrb.mxu1 %v797_v33  ;;  %v838_v33 = vsub.f32 %v1438_v21, %v837_v28 }
  0x8f   :  { %923 = vmatpush.msrb.mxu3 %v1288_v57  ;;  %v819_v23 = vand.u32 4294901760, %v1403_v48  ;;  %743 = vmatpush.msrb.mxu0 %v1405_v49  ;;  %v825_v59 = vand.u32 4294901760, %v1415_v53 }
  0x90   :  { %804 = vmatpush.msrb.mxu1 %v803_v34  ;;  %v843_v34 = vand.u32 4294901760, %v1447_v29  ;;  %v839_v42 = vand.u32 4294901760, %v838_v33 }
  0x91   :  { %925 = vmatpush.msrb.mxu3 %v1290_v61  ;;  %v820_v58 = vsub.f32 %v1403_v48, %v819_v23  ;;  %745 = vmatpush.msrb.mxu0 %v1419_v54  ;;  %v826_v19 = vsub.f32 %v1415_v53, %v825_v59 }
  0x92   :  { %555 = vmatmul.f32.vlgmr.msrb.gmra.mxu2 %v554_v36  ;;  %675 = vmatmul.f32.vlgmr.msra.gmra.mxu3 %v1267_v13  ;;  %v848_v36 = vsub.f32 %v707_v16, %v1449_v30  ;;  %v844_v46 = vsub.f32 %v1447_v29, %v843_v34 }
  0x93   :  { %866 = vmatpush.msrb.mxu2 %v1297_v5  ;;  %927 = vmatpush.msrb.mxu3 %v1292_v62  ;;  %v821_v17 = vand.u32 4294901760, %v820_v58  ;;  %v827_v26 = vand.u32 4294901760, %v826_v19  ;;  %v856_v58 = vsub.f32 %v854_v50, %v855_v55 }
  0x94   :  { %747 = vmatpush.msrb.mxu0 %v1426_v60 }
  0x95   :  { %869 = vmatpush.msrb.mxu2 %v1300_v7  ;;  %929 = vmatpush.msrb.mxu3 %v1294_v63  ;;  %v857_v15 = vand.u32 4294901760, %v856_v58 }
  0x96   :  { %749 = vmatpush.msrb.mxu0 %v1440_v22 }
  0x97   :  { %872 = vmatpush.msrb.mxu2 %v1303_v2  ;;  %931 = vmatpush.msrb.mxu3 %v1306_v3 }
  0x98   :  { %751 = vmatpush.msrb.mxu0 %v1449_v30 }
  0x99   :  { %875 = vmatpush.msrb.mxu2 %v1309_v4  ;;  %933 = vmatpush.msrb.mxu3 %v1380_v37 }
  0x9a   :  { %653 = vmatmul.f32.vlgmr.msra.gmra.mxu2 %v1267_v13  ;;  %v808_v13 = vsub.f32 %v1383_v39, %v807_v44  ;;  %753 = vmatpush.msrb.mxu0 %v1460_v35 }
  0x9b   :  { %878 = vmatpush.msrb.mxu2 %v1312_v6  ;;  %935 = vmatpush.msrb.mxu3 %v1385_v40 }
  0x9c   :  { %v809_v51 = vand.u32 4294901760, %v808_v13  ;;  %v849_v13 = vand.u32 4294901760, %v848_v36  ;;  %960 = vmatpush.msra.mxu0 %v765_v8 }
  0x9d   :  { %881 = vmatpush.msrb.mxu2 %v1319_v11  ;;  %937 = vmatpush.msrb.mxu3 %v1393_v45 }
  0x9e   :  { %810 = vmatpush.msrb.mxu1 %v809_v51  ;;  %v845_v51 = vand.u32 4294901760, %v844_v46  ;;  %v850_v52 = vsub.f32 %v848_v36, %v849_v13  ;;  %964 = vmatpush.msra.mxu0 %v771_v9 }
  0x9f   :  { %884 = vmatpush.msrb.mxu2 %v1323_v14  ;;  %939 = vmatpush.msrb.mxu3 %v1405_v49 }
  0xa0   :  { %816 = vmatpush.msrb.mxu1 %v815_v1  ;;  %v851_v1 = vand.u32 4294901760, %v850_v52  ;;  %968 = vmatpush.msra.mxu0 %v777_v10 }
  0xa1   :  { %887 = vmatpush.msrb.mxu2 %v1383_v39  ;;  %941 = vmatpush.msrb.mxu3 %v1419_v54 }
  0xa2   :  { %822 = vmatpush.msrb.mxu1 %v821_v17  ;;  %972 = vmatpush.msra.mxu0 %v783_v12 }
  0xa3   :  { %890 = vmatpush.msrb.mxu2 %v1391_v43  ;;  %943 = vmatpush.msrb.mxu3 %v1426_v60 }
  0xa4   :  { %828 = vmatpush.msrb.mxu1 %v827_v26  ;;  %976 = vmatpush.msra.mxu0 %v789_v20 }
  0xa5   :  { %893 = vmatpush.msrb.mxu2 %v1403_v48  ;;  %945 = vmatpush.msrb.mxu3 %v1440_v22 }
  0xa6   :  { %834 = vmatpush.msrb.mxu1 %v833_v38  ;;  %980 = vmatpush.msra.mxu0 %v795_v25 }
  0xa7   :  { %896 = vmatpush.msrb.mxu2 %v1415_v53  ;;  %947 = vmatpush.msrb.mxu3 %v1449_v30 }
  0xa8   :  { %840 = vmatpush.msrb.mxu1 %v839_v42  ;;  %984 = vmatpush.msra.mxu0 %v801_v27 }
  0xa9   :  { %899 = vmatpush.msrb.mxu2 %v1430_v0  ;;  %949 = vmatpush.msrb.mxu3 %v1460_v35 }
  0xaa   :  { %846 = vmatpush.msrb.mxu1 %v845_v51  ;;  %988 = vmatpush.msra.mxu0 %v807_v44 }
  0xab   :  { %902 = vmatpush.msrb.mxu2 %v1438_v21 }
  0xac   :  { %852 = vmatpush.msrb.mxu1 %v851_v1  ;;  %992 = vmatpush.msra.mxu0 %v813_v47 }
  0xad   :  { %905 = vmatpush.msrb.mxu2 %v1447_v29 }
  0xae   :  { %858 = vmatpush.msrb.mxu1 %v857_v15  ;;  %996 = vmatpush.msra.mxu0 %v819_v23 }
  0xaf   :  { %908 = vmatpush.msrb.mxu2 %v848_v36 }
  0xb0   :  { %1027 = vmatpush.msra.mxu1 %v1284_v56  ;;  %1000 = vmatpush.msra.mxu0 %v825_v59 }
  0xb1   :  { %911 = vmatpush.msrb.mxu2 %v854_v50 }
  0xb2   :  { %1029 = vmatpush.msra.mxu1 %v1286_v41  ;;  %1004 = vmatpush.msra.mxu0 %v831_v24 }
  0xb4   :  { %1031 = vmatpush.msra.mxu1 %v1288_v57  ;;  %1008 = vmatpush.msra.mxu0 %v837_v28  ;;  %v679_v57 = vld [vmem:[%s1527_s7] sm:$0x1f] }
  0xb5   :  { %vm680_vm9 = vcmp.gt.f32.partialorder %v679_v57, 0.5 }
  0xb6   :  { %1033 = vmatpush.msra.mxu1 %v1290_v61  ;;  %1012 = vmatpush.msra.mxu0 %v843_v34  ;;  %v681_v7 = vsel %vm680_vm9, 1, %v1123_v18  ;;  %v1087_v18 = vld [vmem:[%s1526_s6] ss:$0 sm:$0xff] }
  0xb7   :  { %v687_v9 = vperm.slane %v681_v7, 1  ;;  %v692_v14 = vperm.slane %v681_v7, 2  ;;  %v697_v39 = vperm.slane %v681_v7, 3  ;;  %v702_v59 = vperm.slane %v681_v7, 4 }
  0xb8   :  { %1035 = vmatpush.msra.mxu1 %v1292_v62  ;;  %1016 = vmatpush.msra.mxu0 %v849_v13 }
  0xb9   :  { %vm688_vm11 = vcmp.eq.s32.totalorder %v687_v9, 1  ;;  %vm693_vm12 = vcmp.eq.s32.totalorder %v692_v14, 1  ;;  %vm698_vm13 = vcmp.eq.s32.totalorder %v697_v39, 1  ;;  %vm703_vm14 = vcmp.eq.s32.totalorder %v702_v59, 1 }
  0xba   :  { %1037 = vmatpush.msra.mxu1 %v1294_v63  ;;  %1020 = vmatpush.msra.mxu0 %v855_v55 }
  0xbc   :  { %1039 = vmatpush.msra.mxu1 %v1306_v3  ;;  %v682_v3 = vperm.slane %v681_v7, 0 }
  0xbe   :  { %1041 = vmatpush.msra.mxu1 %v1380_v37  ;;  %vm683_vm10 = vcmp.eq.s32.totalorder %v682_v3, 1 }
  0xc0   :  { %1043 = vmatpush.msra.mxu1 %v1385_v40 }
  0xc2   :  { %1045 = vmatpush.msra.mxu1 %v1393_v45 }
  0xc4   :  { %1047 = vmatpush.msra.mxu1 %v1405_v49 }
  0xc6   :  { %1049 = vmatpush.msra.mxu1 %v1419_v54 }
  0xc8   :  { %1051 = vmatpush.msra.mxu1 %v1426_v60 }
  0xca   :  { %1053 = vmatpush.msra.mxu1 %v1440_v22 }
  0xcc   :  { %1055 = vmatpush.msra.mxu1 %v1449_v30 }
  0xce   :  { %1057 = vmatpush.msra.mxu1 %v1460_v35 }
  0xf1   :  { %v606_v47 = vpop.f32.mrf.mxu0 }
  0xf3   :  { %v630_v23 = vpop.f32.mrf.mxu1 }
  0xf5   :  { %v428_v5 = vpop.f32.mrf.mxu3 }
  0xfd   :  { %v402_v56 = vpop.f32.mrf.mxu2  ;;  %v476_v41 = vpop.f32.mrf.mxu3 }
  0xfe   :  { %v429_v62 = vadd.f32 %v428_v5, %v402_v56 }
 0x105   :  { %v452_v61 = vpop.f32.mrf.mxu2  ;;  %v522_v2 = vpop.f32.mrf.mxu3 }
 0x106   :  { %v453_v63 = vadd.f32 %v452_v61, %v429_v62 }
 0x108   :  { %v477_v4 = vadd.f32 %v476_v41, %v453_v63 }
 0x10d   :  { %v500_v6 = vpop.f32.mrf.mxu2  ;;  %v582_v20 = vpop.f32.mrf.mxu3 }
 0x10e   :  { %v501_v8 = vadd.f32 %v500_v6, %v477_v4 }
 0x110   :  { %v523_v10 = vadd.f32 %v522_v2, %v501_v8 }
 0x112   :  { %v684_v11 = vsel %vm683_vm10, %v523_v10, 1.0  ;;  %v685_v12 = vmul.f32 %v523_v10, %v523_v10 }
 0x114   :  { %v686_v25 = vmul.f32 %v685_v12, %v684_v11  ;;  %v690_v27 = vmul.f32 %v685_v12, %v685_v12 }
 0x115   :  { %v556_v37 = vpop.f32.mrf.mxu2  ;;  %v676_v21 = vpop.f32.mrf.mxu3 }
 0x116   :  { %v689_v40 = vsel %vm688_vm11, %v686_v25, %v684_v11  ;;  %v557_v44 = vadd.f32 %v1087_v18, %v556_v37  ;;  %v695_v45 = vmul.f32 %v690_v27, %v690_v27 }
 0x117   :  { %v691_v43 = vmul.f32 %v690_v27, %v689_v40 }
 0x118   :  { %v583_v48 = vadd.f32 %v582_v20, %v557_v44  ;;  %v700_v60 = vmul.f32 %v695_v45, %v695_v45 }
 0x119   :  { %v694_v49 = vsel %vm693_vm12, %v691_v43, %v689_v40 }
 0x11a   :  { %v696_v53 = vmul.f32 %v695_v45, %v694_v49  ;;  %v607_v54 = vadd.f32 %v606_v47, %v583_v48 }
 0x11c   :  { %v631_v0 = vadd.f32 %v630_v23, %v607_v54  ;;  %v699_v17 = vsel %vm698_vm13, %v696_v53, %v694_v49 }
 0x11d   :  { %v654_v19 = vpop.f32.mrf.mxu2  ;;  %v701_v22 = vmul.f32 %v700_v60, %v699_v17 }
 0x11e   :  { %v655_v24 = vadd.f32 %v654_v19, %v631_v0 }
 0x11f   :  { %v704_v26 = vsel %vm703_vm14, %v701_v22, %v699_v17 }
 0x120   :  { %v677_v16 = vadd.f32 %v676_v21, %v655_v24 }
 0x122   :  { %v705_v28 = vmul.f32 %v704_v26, %v677_v16 }
 0x124   :  { %v754_v29 = vand.u32 4294901760, %v705_v28 }
 0x126   :  { %v755_v30 = vsub.f32 %v705_v28, %v754_v29  ;;  %860 = vmatmul.f32.vlgmr.msrb.gmra.mxu1 %v754_v29 }
 0x128   :  { %914 = vmatmul.f32.vlgmr.msrb.gmra.mxu2 %v755_v30  ;;  %v756_v31 = vand.u32 4294901760, %v755_v30 }
 0x12a   :  { %953 = vmatmul.f32.vlgmr.msrb.gmra.mxu3 %v756_v31  ;;  %v757_v32 = vsub.f32 %v755_v30, %v756_v31 }
 0x12c   :  { %v758_v33 = vand.u32 4294901760, %v757_v32 }
 0x12e   :  { %759 = vmatmul.f32.vlgmr.msrb.gmra.mxu0 %v758_v33  ;;  %1059 = vmatmul.f32.vlgmr.msra.gmra.mxu1 %v754_v29 }
 0x136   :  { %1022 = vmatmul.f32.vlgmr.msra.gmra.mxu0 %v754_v29 }
 0x1a3   :  { %v861_v34 = vpop.f32.mrf.mxu1 }
 0x1ab   :  { %v760_v36 = vpop.f32.mrf.mxu0  ;;  %v915_v38 = vpop.f32.mrf.mxu2 }
 0x1ac   :  { %v862_v35 = vadd.f32 %v861_v34, %v760_v36  ;;  %v1060_v52 = vpop.f32.mrf.mxu1 }
 0x1ad   :  { %v954_v46 = vpop.f32.mrf.mxu3 }
 0x1ae   :  { %v916_v42 = vadd.f32 %v915_v38, %v862_v35 }
 0x1b0   :  { %v955_v13 = vadd.f32 %v954_v46, %v916_v42 }
 0x1b3   :  { %v1023_v50 = vpop.f32.mrf.mxu0 }
 0x1b4   :  { %v1024_v51 = vadd.f32 %v1023_v50, %v955_v13 }
 0x1b6   :  { %v1061_v55 = vadd.f32 %v1060_v52, %v1024_v51 }
 0x1b8   :  { %1063 = vst [vmem:[%s1529_s9] sm:$0xff] %v1061_v55 }
 0x1b9   :  { %1068 = vsyncpa [#allocation3], 1 }

</bundles_post_ra>
